<compile_context>
chip_gen: v5e
topology: v5e:2x2
jax: 0.10.0
libtpu: 0.0.40
codegen_flags: <defaults>
</compile_context>

<pallas_src>
import functools

import jax
import jax.numpy as jnp
from jax.experimental import pallas as pl
from jax.experimental.pallas import tpu as pltpu


def _mlp_kernel(x_ref, w1_ref, b1_ref, w2_ref, b2_ref, w3_ref, b3_ref, o_ref):
    # Layer 1: bf16 MXU matmul, f32 accumulate; bias + ReLU in f32 (VPU).
    h1 = jnp.dot(x_ref[...], w1_ref[...], preferred_element_type=jnp.float32)
    h1 = jnp.maximum(h1 + b1_ref[...], 0.0)
    # Layer 2: feed bf16 back into the MXU, keep f32 accumulation.
    h2 = jnp.dot(h1.astype(jnp.bfloat16), w2_ref[...],
                 preferred_element_type=jnp.float32)
    h2 = jnp.maximum(h2 + b2_ref[...], 0.0)
    # Layer 3 (no activation); output features are padded to a lane-dense width.
    out = jnp.dot(h2.astype(jnp.bfloat16), w3_ref[...],
                  preferred_element_type=jnp.float32)
    o_ref[...] = (out + b3_ref[...]).astype(o_ref.dtype)


@functools.partial(jax.jit, static_argnames=("tb",))
def bpnet_forward(x, w1, b1, w2, b2, w3, b3, *, tb=128):
    """Fused 3-layer MLP forward.

    x:  (B, D0)  float32
    wK: (D_{K-1}, D_K)   (transposed vs. PyTorch's (out, in))
    bK: (1, D_K)
    Returns (B, D3) float32.
    """
    B, D0 = x.shape
    D1 = w1.shape[1]
    D2 = w2.shape[1]
    D3 = w3.shape[1]

    # Lane-dense output: pad the final layer to a multiple of 128 output
    # features (zeros), slice back after the kernel. Free layout plumbing.
    D3p = max(128, ((D3 + 127) // 128) * 128)
    if D3p != D3:
        w3 = jnp.pad(w3, ((0, 0), (0, D3p - D3)))
        b3 = jnp.pad(b3, ((0, 0), (0, D3p - D3)))

    # bf16 operands for native MXU rate + halved HBM/VMEM traffic; biases stay f32.
    x_bf = x.astype(jnp.bfloat16)
    w1 = w1.astype(jnp.bfloat16)
    w2 = w2.astype(jnp.bfloat16)
    w3 = w3.astype(jnp.bfloat16)
    b1 = b1.astype(jnp.float32)
    b2 = b2.astype(jnp.float32)
    b3 = b3.astype(jnp.float32)

    # Batch tile: multiple of 8, capped at 256 so h1/h2/out stay within the
    # 64-vreg budget (no implicit spills); never larger than the padded batch.
    tb = max(8, min(int(tb), 256))
    tb = min(tb, ((B + 7) // 8) * 8)
    grid = (pl.cdiv(B, tb),)

    out = pl.pallas_call(
        _mlp_kernel,
        out_shape=jax.ShapeDtypeStruct((B, D3p), jnp.float32),
        grid_spec=pltpu.PrefetchScalarGridSpec(
            num_scalar_prefetch=0,
            grid=grid,
            in_specs=[
                pl.BlockSpec((tb, D0), lambda i: (i, 0)),    # x tile over batch
                pl.BlockSpec((D0, D1), lambda i: (0, 0)),    # w1 (VMEM-resident)
                pl.BlockSpec((1, D1), lambda i: (0, 0)),     # b1
                pl.BlockSpec((D1, D2), lambda i: (0, 0)),    # w2
                pl.BlockSpec((1, D2), lambda i: (0, 0)),     # b2
                pl.BlockSpec((D2, D3p), lambda i: (0, 0)),   # w3 (padded, lane-dense)
                pl.BlockSpec((1, D3p), lambda i: (0, 0)),    # b3 (padded)
            ],
            out_specs=pl.BlockSpec((tb, D3p), lambda i: (i, 0)),
        ),
        compiler_params=pltpu.CompilerParams(
            dimension_semantics=("parallel",),   # batch tiles shard across TCs (v7x)
            # Explicit VMEM budget: resident weights+biases (~50 KB here) plus
            # double-buffered x/out tiles fit comfortably; 32 MiB is safe on
            # v5e/v6e/v7x (v7x physical VMEM is 64 MiB).
            vmem_limit_bytes=32 * 1024 * 1024,
        ),
    )(x_bf, w1, b1, w2, b2, w3, b3)

    return out[:, :D3]


def init_linear_params(key, in_features, out_features, dtype=jnp.float32):
    """PyTorch-style nn.Linear init: U(-1/sqrt(in), 1/sqrt(in)) for W and b."""
    kw, kb = jax.random.split(key)
    bound = 1.0 / (in_features ** 0.5)
    # Stored transposed: (in_features, out_features).
    w = jax.random.uniform(kw, (in_features, out_features), dtype,
                           minval=-bound, maxval=bound)
    b = jax.random.uniform(kb, (1, out_features), dtype,
                           minval=-bound, maxval=bound)
    return w, b


if __name__ == "__main__":
    # net_size = [D0, D1, D2, D3]  — matches BpNet(nn.Linear chain) widths.
    net_size = (32, 64, 64, 16)
    batch = 256   # 2 grid steps at tb=128 -> both v7x TensorCores get work.
    tb = 128

    root = jax.random.PRNGKey(0)
    kx, k1, k2, k3 = jax.random.split(root, 4)

    x = jax.random.normal(kx, (batch, net_size[0]), jnp.float32)
    w1, b1 = init_linear_params(k1, net_size[0], net_size[1])
    w2, b2 = init_linear_params(k2, net_size[1], net_size[2])
    w3, b3 = init_linear_params(k3, net_size[2], net_size[3])

    out = bpnet_forward(x, w1, b1, w2, b2, w3, b3, tb=tb)
    out = jax.block_until_ready(out)
    assert out.shape == (batch, net_size[3])

    # Reference 1: mirror the kernel's bf16-operand / f32-accumulate numerics.
    def rt_bf16(a):
        return a.astype(jnp.bfloat16).astype(jnp.float32)

    h = jnp.maximum(rt_bf16(x) @ rt_bf16(w1) + b1, 0.0)
    h = jnp.maximum(rt_bf16(h) @ rt_bf16(w2) + b2, 0.0)
    ref_bf = rt_bf16(h) @ rt_bf16(w3) + b3
    assert jnp.allclose(out, ref_bf, atol=1e-3, rtol=1e-3), "mismatch vs bf16 reference"

    # Reference 2: pure-f32 PyTorch-equivalent semantics (loose tol for bf16 operands).
    h = jnp.maximum(x @ w1 + b1, 0.0)
    h = jnp.maximum(h @ w2 + b2, 0.0)
    ref_f32 = h @ w3 + b3
    assert jnp.allclose(out, ref_f32, atol=5e-2, rtol=5e-2), "mismatch vs f32 reference"

    print("KERNEL_OK")
</pallas_src>

<mosaic_0001>
module attributes {stable_mosaic.version = 11 : i64} {
  func.func @_mlp_kernel(%arg0: i32, %arg1: memref<128x32xbf16, #tpu.memory_space<vmem>>, %arg2: memref<32x64xbf16, #tpu.memory_space<vmem>>, %arg3: memref<1x64xf32, #tpu.memory_space<vmem>>, %arg4: memref<64x64xbf16, #tpu.memory_space<vmem>>, %arg5: memref<1x64xf32, #tpu.memory_space<vmem>>, %arg6: memref<64x128xbf16, #tpu.memory_space<vmem>>, %arg7: memref<1x128xf32, #tpu.memory_space<vmem>>, %arg8: memref<128x128xf32, #tpu.memory_space<vmem>>) attributes {dimension_semantics = [#tpu.dimension_semantics<parallel>], iteration_bounds = array<i64: 2>, scalar_prefetch = 0 : i64, scratch_operands = 0 : i64, tpu.core_type = #tpu.core_type<tc>, window_params = [{transform_indices = @transform_0, window_bounds = array<i64: 128, 32>}, {pipeline_mode = #tpu.pipeline_mode<synchronous>, transform_indices = @transform_1, window_bounds = array<i64: 32, 64>}, {pipeline_mode = #tpu.pipeline_mode<synchronous>, transform_indices = @transform_2, window_bounds = array<i64: 1, 64>}, {pipeline_mode = #tpu.pipeline_mode<synchronous>, transform_indices = @transform_3, window_bounds = array<i64: 64, 64>}, {pipeline_mode = #tpu.pipeline_mode<synchronous>, transform_indices = @transform_4, window_bounds = array<i64: 1, 64>}, {pipeline_mode = #tpu.pipeline_mode<synchronous>, transform_indices = @transform_5, window_bounds = array<i64: 64, 128>}, {pipeline_mode = #tpu.pipeline_mode<synchronous>, transform_indices = @transform_6, window_bounds = array<i64: 1, 128>}, {transform_indices = @transform_7, window_bounds = array<i64: 128, 128>}]} {
    %c0 = arith.constant 0 : index
    %c0_0 = arith.constant 0 : index
    %0 = vector.load %arg1[%c0, %c0_0] : memref<128x32xbf16, #tpu.memory_space<vmem>>, vector<128x32xbf16>
    %c0_1 = arith.constant 0 : index
    %c0_2 = arith.constant 0 : index
    %1 = vector.load %arg2[%c0_1, %c0_2] : memref<32x64xbf16, #tpu.memory_space<vmem>>, vector<32x64xbf16>
    %cst = arith.constant dense<0.000000e+00> : vector<128x64xf32>
    %2 = tpu.matmul %0, %1, %cst {dimension_numbers = #tpu.dot_dimension_numbers<[1], [0], [0], [1], [0, 0, 1, 1], [], []>} : vector<128x32xbf16>, vector<32x64xbf16>, vector<128x64xf32> -> vector<128x64xf32>
    %c0_3 = arith.constant 0 : index
    %c0_4 = arith.constant 0 : index
    %3 = vector.load %arg3[%c0_3, %c0_4] : memref<1x64xf32, #tpu.memory_space<vmem>>, vector<1x64xf32>
    %4 = vector.broadcast %3 : vector<1x64xf32> to vector<128x64xf32>
    %5 = arith.addf %2, %4 : vector<128x64xf32>
    %cst_5 = arith.constant 0.000000e+00 : f32
    %6 = vector.broadcast %cst_5 : f32 to vector<128x64xf32>
    %7 = arith.maximumf %5, %6 : vector<128x64xf32>
    %8 = arith.truncf %7 : vector<128x64xf32> to vector<128x64xbf16>
    %c0_6 = arith.constant 0 : index
    %c0_7 = arith.constant 0 : index
    %9 = vector.load %arg4[%c0_6, %c0_7] : memref<64x64xbf16, #tpu.memory_space<vmem>>, vector<64x64xbf16>
    %cst_8 = arith.constant dense<0.000000e+00> : vector<128x64xf32>
    %10 = tpu.matmul %8, %9, %cst_8 {dimension_numbers = #tpu.dot_dimension_numbers<[1], [0], [0], [1], [0, 0, 1, 1], [], []>} : vector<128x64xbf16>, vector<64x64xbf16>, vector<128x64xf32> -> vector<128x64xf32>
    %c0_9 = arith.constant 0 : index
    %c0_10 = arith.constant 0 : index
    %11 = vector.load %arg5[%c0_9, %c0_10] : memref<1x64xf32, #tpu.memory_space<vmem>>, vector<1x64xf32>
    %12 = vector.broadcast %11 : vector<1x64xf32> to vector<128x64xf32>
    %13 = arith.addf %10, %12 : vector<128x64xf32>
    %cst_11 = arith.constant 0.000000e+00 : f32
    %14 = vector.broadcast %cst_11 : f32 to vector<128x64xf32>
    %15 = arith.maximumf %13, %14 : vector<128x64xf32>
    %16 = arith.truncf %15 : vector<128x64xf32> to vector<128x64xbf16>
    %c0_12 = arith.constant 0 : index
    %c0_13 = arith.constant 0 : index
    %17 = vector.load %arg6[%c0_12, %c0_13] : memref<64x128xbf16, #tpu.memory_space<vmem>>, vector<64x128xbf16>
    %cst_14 = arith.constant dense<0.000000e+00> : vector<128x128xf32>
    %18 = tpu.matmul %16, %17, %cst_14 {dimension_numbers = #tpu.dot_dimension_numbers<[1], [0], [0], [1], [0, 0, 1, 1], [], []>} : vector<128x64xbf16>, vector<64x128xbf16>, vector<128x128xf32> -> vector<128x128xf32>
    %c0_15 = arith.constant 0 : index
    %c0_16 = arith.constant 0 : index
    %19 = vector.load %arg7[%c0_15, %c0_16] : memref<1x128xf32, #tpu.memory_space<vmem>>, vector<1x128xf32>
    %20 = vector.broadcast %19 : vector<1x128xf32> to vector<128x128xf32>
    %21 = arith.addf %18, %20 : vector<128x128xf32>
    %c0_17 = arith.constant 0 : index
    %c0_18 = arith.constant 0 : index
    %22 = vector.load %arg8[%c0_17, %c0_18] : memref<128x128xf32, #tpu.memory_space<vmem>>, vector<128x128xf32>
    tpu.vector_store %arg8[%c0_17, %c0_18], %21 {strides = array<i32>} : memref<128x128xf32, #tpu.memory_space<vmem>>, vector<128x128xf32>,
    return
  }
  func.func @transform_0(%arg0: i32) -> (i32, i32) {
    %c0_i32 = arith.constant 0 : i32
    %c0_i32_0 = arith.constant 0 : i32
    return %arg0, %c0_i32 : i32, i32
  }
  func.func @transform_1(%arg0: i32) -> (i32, i32) {
    %c0_i32 = arith.constant 0 : i32
    %c0_i32_0 = arith.constant 0 : i32
    %c0_i32_1 = arith.constant 0 : i32
    return %c0_i32, %c0_i32_0 : i32, i32
  }
  func.func @transform_2(%arg0: i32) -> (i32, i32) {
    %c0_i32 = arith.constant 0 : i32
    %c0_i32_0 = arith.constant 0 : i32
    %c0_i32_1 = arith.constant 0 : i32
    return %c0_i32, %c0_i32_0 : i32, i32
  }
  func.func @transform_3(%arg0: i32) -> (i32, i32) {
    %c0_i32 = arith.constant 0 : i32
    %c0_i32_0 = arith.constant 0 : i32
    %c0_i32_1 = arith.constant 0 : i32
    return %c0_i32, %c0_i32_0 : i32, i32
  }
  func.func @transform_4(%arg0: i32) -> (i32, i32) {
    %c0_i32 = arith.constant 0 : i32
    %c0_i32_0 = arith.constant 0 : i32
    %c0_i32_1 = arith.constant 0 : i32
    return %c0_i32, %c0_i32_0 : i32, i32
  }
  func.func @transform_5(%arg0: i32) -> (i32, i32) {
    %c0_i32 = arith.constant 0 : i32
    %c0_i32_0 = arith.constant 0 : i32
    %c0_i32_1 = arith.constant 0 : i32
    return %c0_i32, %c0_i32_0 : i32, i32
  }
  func.func @transform_6(%arg0: i32) -> (i32, i32) {
    %c0_i32 = arith.constant 0 : i32
    %c0_i32_0 = arith.constant 0 : i32
    %c0_i32_1 = arith.constant 0 : i32
    return %c0_i32, %c0_i32_0 : i32, i32
  }
  func.func @transform_7(%arg0: i32) -> (i32, i32) {
    %c0_i32 = arith.constant 0 : i32
    %c0_i32_0 = arith.constant 0 : i32
    return %arg0, %c0_i32 : i32, i32
  }
}

</mosaic_0001>

<bundles_post_ra>
// kernel: bpnet_forward.1
= control target key start
LH: loop header
LB: loop body
LE: loop exit
PB: predicated region body
PF: predicated region fallthrough
CT: control target
= control target key end

     0   :  { %s966_s24 = smov 0   ;;  %s1086_s0 = inlined_call_operand.vmem [shape: bf16[256,32], index: 0, kind: input, shape index: {}]   ;;  %s1087_s1 = inlined_call_operand.vmem [shape: bf16[32,64], index: 1, kind: input, shape index: {}]   ;;  %s1088_s2 = inlined_call_operand.vmem [shape: f32[1,64], index: 2, kind: input, shape index: {}]   ;;  %s1089_s3 = inlined_call_operand.vmem [shape: bf16[64,64], index: 3, kind: input, shape index: {}]   ;;  %s1090_s4 = inlined_call_operand.vmem [shape: f32[1,64], index: 4, kind: input, shape index: {}]   ;;  %s1091_s5 = inlined_call_operand.vmem [shape: bf16[64,128], index: 5, kind: input, shape index: {}]   ;;  %s1092_s6 = inlined_call_operand.vmem [shape: f32[1,128], index: 6, kind: input, shape index: {}]   ;;  %s1093_s7 = inlined_call_operand.vmem [shape: f32[256,128], index: 7, kind: output, shape index: {}]  }
   0x1 LB: > { %s772_s25 = sadd.s32 4294967295, %s924_s24   ;;  %p776_p0 = scmp.ge.s32.totalorder %s924_s24, 1  ;;  %s924_s24 = sphi %s966_s24, %s17_s24  }
   0x2   : > { %p238_p1 = scmp.lt.s32.totalorder %s924_s24, 3 }
   0x4   : > { %p239_p2 = pnand %p776_p0, %p238_p1 }
   0x5   : > { %s777_s28 = sshll.u32 (!%p239_p2), %s772_s25, 4 }
   0x6   : > { %242 = sbr.rel (%p239_p2) target bundleno = 560 (0x230), region = 48  ;;  %p271_p3 = scmp.lt.s32.totalorder (!%p239_p2), %s777_s28, 31 }
   0xb   : > { %v888_v0 = vld [vmem:[%s1087_s1 + $0x8] sm:$0xff]  ;;  %v887_v1 = vld [vmem:[%s1087_s1] sm:$0xff]  ;;  %s1095_s28 = smov (!%p271_p3, %s777_s28), 31  ;;  %vm359_vm0 = vcmask 261120   ;;  %v892_v9 = vld [vmem:[%s1089_s3 + $0x18] sm:$0xff]  ;;  %vm493_vm1 = vcmask 523264  }
   0xc   : > { %390 = vmatpush.bf16.msra.mxu0 %v888_v0  ;;  %897 = vmatpush.bf16.msra.mxu3 %v888_v0  ;;  %s778_s8 = sshll.u32 %s1095_s28, 2  ;;  %v891_v11 = vld [vmem:[%s1089_s3 + $0x10] sm:$0xff]  ;;  %v890_v12 = vld [vmem:[%s1089_s3 + $0x8] sm:$0xff]  ;;  %v889_v13 = vld [vmem:[%s1089_s3] sm:$0xff] }
   0xd   : > { %s274_s11 = scalar_lea.vmem %s1086_s0, %s778_s8  ;;  %522 = vmatpush.bf16.msra.mxu1 %v892_v9  ;;  %v1009_v15 = vld [vmem:[%s1088_s2] ss:$0 sm:$0xff]  ;;  %v896_v62 = vld [vmem:[%s1091_s5 + $0x18] sm:$0xff] }
   0xe   : > { %v879_v2 = vld [vmem:[%s274_s11] sm:$0xff]  ;;  %v880_v3 = vld [vmem:[%s274_s11 + $0x8] sm:$0xff]  ;;  %v881_v4 = vld [vmem:[%s274_s11 + $0x10] sm:$0xff]  ;;  %655 = vmatpush.bf16.msra.mxu2 %v896_v62 }
   0xf   : > { %v882_v5 = vld [vmem:[%s274_s11 + $0x18] sm:$0xff]  ;;  %v883_v6 = vld [vmem:[%s274_s11 + $0x20] sm:$0xff]  ;;  %v884_v8 = vld [vmem:[%s274_s11 + $0x28] sm:$0xff] }
  0x10   : > { %391 = vmatpush.bf16.msra.mxu0 %v887_v1  ;;  %898 = vmatpush.bf16.msra.mxu3 %v887_v1  ;;  %v886_v7 = vld [vmem:[%s274_s11 + $0x38] sm:$0xff]  ;;  %v885_v10 = vld [vmem:[%s274_s11 + $0x30] sm:$0xff]  ;;  %s780_s11 = sshll.u32 %s1095_s28, 3 }
  0x11   : > { %523 = vmatpush.bf16.msra.mxu1 %v891_v11  ;;  %s1065_s16 = scalar_lea.vmem %s1093_s7, %s780_s11 }
  0x13   : > { %821 = vmatmul.msk.bf16.vlgmr.msra.gmra.mxu0 %vm359_vm0, %v879_v2  ;;  %828 = vmatmul.msk.bf16.vlgmr.msra.gmra.mxu3 %vm359_vm0, %v886_v7  ;;  %v895_v2 = vld [vmem:[%s1091_s5 + $0x10] sm:$0xff]  ;;  %v893_v7 = vld [vmem:[%s1091_s5] sm:$0xff] }
  0x14   : > { %899 = vmatpush.bf16.msrb.mxu3 %v892_v9  ;;  %656 = vmatpush.bf16.msra.mxu2 %v895_v2 }
  0x15   : > { %524 = vmatpush.bf16.msra.mxu1 %v890_v12 }
  0x18   : > { %900 = vmatpush.bf16.msrb.mxu3 %v891_v11 }
  0x19   : > { %525 = vmatpush.bf16.msra.mxu1 %v889_v13 }
  0x1c   : > { %901 = vmatpush.bf16.msrb.mxu3 %v890_v12  ;;  %v916_v12 = vld [vmem:[%s1090_s4] ss:$0 sm:$0xff] }
  0x20   : > { %902 = vmatpush.bf16.msrb.mxu3 %v889_v13 }
  0x23   : > { %822 = vmatmul.msk.bf16.gmra.mxu0 %vm359_vm0, %v880_v3 }
  0x24   : > { %903 = vmatpush.bf16.msra.mxu3 %v896_v62 }
  0x28   : > { %904 = vmatpush.bf16.msra.mxu3 %v895_v2 }
  0x33   : > { %823 = vmatmul.msk.bf16.gmra.mxu0 %vm359_vm0, %v881_v4  ;;  %v894_v4 = vld [vmem:[%s1091_s5 + $0x8] sm:$0xff] }
  0x34   : > { %657 = vmatpush.bf16.msra.mxu2 %v894_v4  ;;  %905 = vmatpush.bf16.msra.mxu3 %v894_v4  ;;  %v917_v4 = vld [vmem:[%s1092_s6] ss:$0 sm:$0xff] }
  0x38   : > { %658 = vmatpush.bf16.msra.mxu2 %v893_v7  ;;  %906 = vmatpush.bf16.msra.mxu3 %v893_v7 }
  0x43   : > { %824 = vmatmul.msk.bf16.gmra.mxu0 %vm359_vm0, %v882_v5 }
  0x53   : > { %825 = vmatmul.msk.bf16.gmra.mxu0 %vm359_vm0, %v883_v6 }
  0x63   : > { %826 = vmatmul.msk.bf16.gmra.mxu0 %vm359_vm0, %v884_v8 }
  0x73   : > { %827 = vmatmul.msk.bf16.gmra.mxu0 %vm359_vm0, %v885_v10 }
  0x90   : > { %v393_v14 = vpop.f32.mrf.mxu0 }
  0x91   : > { %v394_v16 = vadd.f32 %v1009_v15, %v393_v14 }
  0x93   : > { %v433_v19 = vmax.f32 %v394_v16, 0.0 }
  0x96   : > { %v428_v60 = vpop.f32.mrf.mxu3 }
  0x97   : > { %v429_v5 = vadd.f32 %v1009_v15, %v428_v60 }
  0x98   : > { %v395_v17 = vpop.f32.mrf.mxu0 }
  0x99   : > { %v396_v18 = vadd.f32 %v1009_v15, %v395_v17  ;;  %v447_v8 = vmax.f32 %v429_v5, 0.0 }
  0x9b   : > { %v434_v20 = vmax.f32 %v396_v18, 0.0 }
  0x9d   : > { %v449_v21 = vpack.c.bf16 %v434_v20, %v433_v19 }
  0x9e   : > { %v430_v3 = vpop.f32.mrf.mxu3 }
  0x9f   : > { %845 = vmatmul.msk.bf16.vlgmr.msra.gmra.mxu1 %vm493_vm1, %v449_v21  ;;  %v431_v6 = vadd.f32 %v1009_v15, %v430_v3 }
  0xa0   : > { %v398_v22 = vpop.f32.mrf.mxu0 }
  0xa1   : > { %v399_v23 = vadd.f32 %v1009_v15, %v398_v22  ;;  %v448_v9 = vmax.f32 %v431_v6, 0.0 }
  0xa3   : > { %v435_v26 = vmax.f32 %v399_v23, 0.0  ;;  %v456_v10 = vpack.c.bf16 %v448_v9, %v447_v8 }
  0xa8   : > { %v400_v24 = vpop.f32.mrf.mxu0 }
  0xa9   : > { %v401_v25 = vadd.f32 %v1009_v15, %v400_v24 }
  0xab   : > { %v436_v27 = vmax.f32 %v401_v25, 0.0 }
  0xad   : > { %v450_v28 = vpack.c.bf16 %v436_v27, %v435_v26 }
  0xaf   : > { %846 = vmatmul.msk.bf16.gmra.mxu1 %vm493_vm1, %v450_v28 }
  0xb0   : > { %v403_v29 = vpop.f32.mrf.mxu0 }
  0xb1   : > { %v404_v30 = vadd.f32 %v1009_v15, %v403_v29 }
  0xb3   : > { %v437_v33 = vmax.f32 %v404_v30, 0.0 }
  0xb8   : > { %v405_v31 = vpop.f32.mrf.mxu0 }
  0xb9   : > { %v406_v32 = vadd.f32 %v1009_v15, %v405_v31 }
  0xbb   : > { %v438_v34 = vmax.f32 %v406_v32, 0.0 }
  0xbd   : > { %v451_v35 = vpack.c.bf16 %v438_v34, %v437_v33 }
  0xbf   : > { %847 = vmatmul.msk.bf16.gmra.mxu1 %vm493_vm1, %v451_v35 }
  0xc0   : > { %v408_v36 = vpop.f32.mrf.mxu0 }
  0xc1   : > { %v409_v37 = vadd.f32 %v1009_v15, %v408_v36 }
  0xc3   : > { %v439_v40 = vmax.f32 %v409_v37, 0.0 }
  0xc8   : > { %v410_v38 = vpop.f32.mrf.mxu0 }
  0xc9   : > { %v411_v39 = vadd.f32 %v1009_v15, %v410_v38 }
  0xcb   : > { %v440_v41 = vmax.f32 %v411_v39, 0.0 }
  0xcd   : > { %v452_v42 = vpack.c.bf16 %v440_v41, %v439_v40 }
  0xcf   : > { %848 = vmatmul.msk.bf16.gmra.mxu1 %vm493_vm1, %v452_v42 }
  0xd0   : > { %v413_v43 = vpop.f32.mrf.mxu0 }
  0xd1   : > { %v414_v44 = vadd.f32 %v1009_v15, %v413_v43 }
  0xd3   : > { %v441_v47 = vmax.f32 %v414_v44, 0.0 }
  0xd8   : > { %v415_v45 = vpop.f32.mrf.mxu0 }
  0xd9   : > { %v416_v46 = vadd.f32 %v1009_v15, %v415_v45 }
  0xdb   : > { %v442_v48 = vmax.f32 %v416_v46, 0.0 }
  0xdd   : > { %v453_v49 = vpack.c.bf16 %v442_v48, %v441_v47 }
  0xdf   : > { %849 = vmatmul.msk.bf16.gmra.mxu1 %vm493_vm1, %v453_v49 }
  0xe0   : > { %v418_v50 = vpop.f32.mrf.mxu0 }
  0xe1   : > { %v419_v51 = vadd.f32 %v1009_v15, %v418_v50 }
  0xe3   : > { %v443_v54 = vmax.f32 %v419_v51, 0.0 }
  0xe8   : > { %v420_v52 = vpop.f32.mrf.mxu0 }
  0xe9   : > { %v421_v53 = vadd.f32 %v1009_v15, %v420_v52 }
  0xeb   : > { %v444_v55 = vmax.f32 %v421_v53, 0.0 }
  0xed   : > { %v454_v56 = vpack.c.bf16 %v444_v55, %v443_v54 }
  0xef   : > { %850 = vmatmul.msk.bf16.gmra.mxu1 %vm493_vm1, %v454_v56 }
  0xf0   : > { %v423_v57 = vpop.f32.mrf.mxu0 }
  0xf1   : > { %v424_v58 = vadd.f32 %v1009_v15, %v423_v57 }
  0xf3   : > { %v445_v63 = vmax.f32 %v424_v58, 0.0 }
  0xf8   : > { %v425_v59 = vpop.f32.mrf.mxu0 }
  0xf9   : > { %v426_v61 = vadd.f32 %v1009_v15, %v425_v59 }
  0xfb   : > { %v446_v0 = vmax.f32 %v426_v61, 0.0 }
  0xfd   : > { %v455_v1 = vpack.c.bf16 %v446_v0, %v445_v63 }
  0xff   : > { %851 = vmatmul.msk.bf16.vlgmr.msrb.gmra.mxu3 %vm493_vm1, %v455_v1 }
 0x10f   : > { %852 = vmatmul.msk.bf16.gmra.mxu3 %vm493_vm1, %v456_v10 }
 0x11c   : > { %v527_v11 = vpop.f32.mrf.mxu1 }
 0x11d   : > { %v528_v13 = vadd.f32 %v916_v12, %v527_v11 }
 0x11f   : > { %v567_v15 = vmax.f32 %v528_v13, 0.0 }
 0x124   : > { %v529_v14 = vpop.f32.mrf.mxu1 }
 0x125   : > { %v530_v16 = vadd.f32 %v916_v12, %v529_v14 }
 0x127   : > { %v568_v17 = vmax.f32 %v530_v16, 0.0 }
 0x129   : > { %v583_v18 = vpack.c.bf16 %v568_v17, %v567_v15 }
 0x12b   : > { %869 = vmatmul.msk.bf16.vlgmr.msra.gmra.mxu2 %vm493_vm1, %v583_v18 }
 0x12c   : > { %v532_v19 = vpop.f32.mrf.mxu1 }
 0x12d   : > { %v533_v20 = vadd.f32 %v916_v12, %v532_v19 }
 0x12f   : > { %v569_v23 = vmax.f32 %v533_v20, 0.0 }
 0x134   : > { %v534_v21 = vpop.f32.mrf.mxu1 }
 0x135   : > { %v535_v22 = vadd.f32 %v916_v12, %v534_v21 }
 0x137   : > { %v570_v24 = vmax.f32 %v535_v22, 0.0 }
 0x139   : > { %v584_v25 = vpack.c.bf16 %v570_v24, %v569_v23 }
 0x13b   : > { %870 = vmatmul.msk.bf16.gmra.mxu2 %vm493_vm1, %v584_v25 }
 0x13c   : > { %v537_v26 = vpop.f32.mrf.mxu1 }
 0x13d   : > { %v538_v27 = vadd.f32 %v916_v12, %v537_v26 }
 0x13f   : > { %v571_v30 = vmax.f32 %v538_v27, 0.0 }
 0x144   : > { %v539_v28 = vpop.f32.mrf.mxu1 }
 0x145   : > { %v540_v29 = vadd.f32 %v916_v12, %v539_v28 }
 0x147   : > { %v572_v31 = vmax.f32 %v540_v29, 0.0 }
 0x149   : > { %v585_v32 = vpack.c.bf16 %v572_v31, %v571_v30 }
 0x14b   : > { %871 = vmatmul.msk.bf16.gmra.mxu2 %vm493_vm1, %v585_v32 }
 0x14c   : > { %v542_v33 = vpop.f32.mrf.mxu1 }
 0x14d   : > { %v543_v34 = vadd.f32 %v916_v12, %v542_v33 }
 0x14f   : > { %v573_v37 = vmax.f32 %v543_v34, 0.0 }
 0x154   : > { %v544_v35 = vpop.f32.mrf.mxu1 }
 0x155   : > { %v545_v36 = vadd.f32 %v916_v12, %v544_v35 }
 0x157   : > { %v574_v38 = vmax.f32 %v545_v36, 0.0 }
 0x159   : > { %v586_v39 = vpack.c.bf16 %v574_v38, %v573_v37 }
 0x15b   : > { %872 = vmatmul.msk.bf16.gmra.mxu2 %vm493_vm1, %v586_v39 }
 0x15c   : > { %v547_v40 = vpop.f32.mrf.mxu1 }
 0x15d   : > { %v548_v41 = vadd.f32 %v916_v12, %v547_v40 }
 0x15f   : > { %v575_v44 = vmax.f32 %v548_v41, 0.0 }
 0x164   : > { %v549_v42 = vpop.f32.mrf.mxu1 }
 0x165   : > { %v550_v43 = vadd.f32 %v916_v12, %v549_v42 }
 0x167   : > { %v576_v45 = vmax.f32 %v550_v43, 0.0 }
 0x169   : > { %v587_v46 = vpack.c.bf16 %v576_v45, %v575_v44 }
 0x16b   : > { %873 = vmatmul.msk.bf16.gmra.mxu2 %vm493_vm1, %v587_v46 }
 0x16c   : > { %v552_v47 = vpop.f32.mrf.mxu1 }
 0x16d   : > { %v553_v48 = vadd.f32 %v916_v12, %v552_v47 }
 0x16f   : > { %v577_v51 = vmax.f32 %v553_v48, 0.0 }
 0x174   : > { %v554_v49 = vpop.f32.mrf.mxu1 }
 0x175   : > { %v555_v50 = vadd.f32 %v916_v12, %v554_v49 }
 0x177   : > { %v578_v52 = vmax.f32 %v555_v50, 0.0 }
 0x179   : > { %v588_v53 = vpack.c.bf16 %v578_v52, %v577_v51 }
 0x17b   : > { %874 = vmatmul.msk.bf16.gmra.mxu2 %vm493_vm1, %v588_v53 }
 0x182   : > { %v557_v54 = vpop.f32.mrf.mxu3 }
 0x183   : > { %v558_v55 = vadd.f32 %v916_v12, %v557_v54 }
 0x185   : > { %v579_v58 = vmax.f32 %v558_v55, 0.0 }
 0x18a   : > { %v559_v56 = vpop.f32.mrf.mxu3 }
 0x18b   : > { %v560_v57 = vadd.f32 %v916_v12, %v559_v56 }
 0x18d   : > { %v580_v59 = vmax.f32 %v560_v57, 0.0 }
 0x18f   : > { %v589_v60 = vpack.c.bf16 %v580_v59, %v579_v58 }
 0x191   : > { %875 = vmatmul.msk.bf16.vlgmr.msra.gmra.mxu3 %vm493_vm1, %v589_v60 }
 0x192   : > { %v562_v61 = vpop.f32.mrf.mxu3 }
 0x193   : > { %v563_v62 = vadd.f32 %v916_v12, %v562_v61 }
 0x195   : > { %v581_v1 = vmax.f32 %v563_v62, 0.0 }
 0x19a   : > { %v564_v63 = vpop.f32.mrf.mxu3 }
 0x19b   : > { %v565_v0 = vadd.f32 %v916_v12, %v564_v63 }
 0x19d   : > { %v582_v2 = vmax.f32 %v565_v0, 0.0 }
 0x19f   : > { %v590_v3 = vpack.c.bf16 %v582_v2, %v581_v1 }
 0x1a1   : > { %876 = vmatmul.msk.bf16.gmra.mxu3 %vm493_vm1, %v590_v3 }
 0x1ae   : > { %v660_v5 = vpop.f32.mrf.mxu2 }
 0x1af   : > { %v661_v6 = vadd.f32 %v917_v4, %v660_v5 }
 0x1b1   : > { %700 = vst [vmem:[%s1065_s16] sm:$0xff] %v661_v6 }
 0x1b6   : > { %v662_v7 = vpop.f32.mrf.mxu2 }
 0x1b7   : > { %v663_v8 = vadd.f32 %v917_v4, %v662_v7 }
 0x1b9   : > { %701 = vst [vmem:[%s1065_s16 + $0x8] sm:$0xff] %v663_v8 }
 0x1be   : > { %v665_v9 = vpop.f32.mrf.mxu2 }
 0x1bf   : > { %v666_v10 = vadd.f32 %v917_v4, %v665_v9 }
 0x1c1   : > { %702 = vst [vmem:[%s1065_s16 + $0x10] sm:$0xff] %v666_v10 }
 0x1c6   : > { %v667_v11 = vpop.f32.mrf.mxu2 }
 0x1c7   : > { %v668_v12 = vadd.f32 %v917_v4, %v667_v11 }
 0x1c9   : > { %703 = vst [vmem:[%s1065_s16 + $0x18] sm:$0xff] %v668_v12 }
 0x1ce   : > { %v670_v13 = vpop.f32.mrf.mxu2 }
 0x1cf   : > { %v671_v14 = vadd.f32 %v917_v4, %v670_v13 }
 0x1d1   : > { %704 = vst [vmem:[%s1065_s16 + $0x20] sm:$0xff] %v671_v14 }
 0x1d6   : > { %v672_v16 = vpop.f32.mrf.mxu2 }
 0x1d7   : > { %v673_v15 = vadd.f32 %v917_v4, %v672_v16 }
 0x1d9   : > { %705 = vst [vmem:[%s1065_s16 + $0x28] sm:$0xff] %v673_v15 }
 0x1de   : > { %v675_v17 = vpop.f32.mrf.mxu2 }
 0x1df   : > { %v676_v18 = vadd.f32 %v917_v4, %v675_v17 }
 0x1e1   : > { %706 = vst [vmem:[%s1065_s16 + $0x30] sm:$0xff] %v676_v18 }
 0x1e6   : > { %v677_v19 = vpop.f32.mrf.mxu2 }
 0x1e7   : > { %v678_v20 = vadd.f32 %v917_v4, %v677_v19 }
 0x1e9   : > { %707 = vst [vmem:[%s1065_s16 + $0x38] sm:$0xff] %v678_v20 }
 0x1ee   : > { %v680_v21 = vpop.f32.mrf.mxu2 }
 0x1ef   : > { %v681_v22 = vadd.f32 %v917_v4, %v680_v21 }
 0x1f1   : > { %708 = vst [vmem:[%s1065_s16 + $0x40] sm:$0xff] %v681_v22 }
 0x1f6   : > { %v682_v23 = vpop.f32.mrf.mxu2 }
 0x1f7   : > { %v683_v24 = vadd.f32 %v917_v4, %v682_v23 }
 0x1f9   : > { %709 = vst [vmem:[%s1065_s16 + $0x48] sm:$0xff] %v683_v24 }
 0x1fe   : > { %v685_v25 = vpop.f32.mrf.mxu2 }
 0x1ff   : > { %v686_v26 = vadd.f32 %v917_v4, %v685_v25 }
 0x201   : > { %710 = vst [vmem:[%s1065_s16 + $0x50] sm:$0xff] %v686_v26 }
 0x206   : > { %v687_v27 = vpop.f32.mrf.mxu2 }
 0x207   : > { %v688_v28 = vadd.f32 %v917_v4, %v687_v27 }
 0x209   : > { %711 = vst [vmem:[%s1065_s16 + $0x58] sm:$0xff] %v688_v28 }
 0x214   : > { %v690_v29 = vpop.f32.mrf.mxu3 }
 0x215   : > { %v691_v30 = vadd.f32 %v917_v4, %v690_v29 }
 0x217   : > { %712 = vst [vmem:[%s1065_s16 + $0x60] sm:$0xff] %v691_v30 }
 0x21c   : > { %v692_v31 = vpop.f32.mrf.mxu3 }
 0x21d   : > { %v693_v32 = vadd.f32 %v917_v4, %v692_v31 }
 0x21f   : > { %713 = vst [vmem:[%s1065_s16 + $0x68] sm:$0xff] %v693_v32 }
 0x224   : > { %v695_v33 = vpop.f32.mrf.mxu3 }
 0x225   : > { %v696_v34 = vadd.f32 %v917_v4, %v695_v33 }
 0x227   : > { %714 = vst [vmem:[%s1065_s16 + $0x70] sm:$0xff] %v696_v34 }
 0x22c   : > { %v697_v35 = vpop.f32.mrf.mxu3 }
 0x22d   : > { %v698_v36 = vadd.f32 %v917_v4, %v697_v35 }
 0x22f   : > { %715 = vst [vmem:[%s1065_s16 + $0x78] sm:$0xff] %v698_v36 }
 0x230 PF: > { %s17_s24 = sadd.s32 1, %s924_s24  }
 0x231   : > { %p14_p4 = scmp.ge.s32.totalorder %s17_s24, 4  }
 0x233   :  { %16 = sbr.rel (!%p14_p4) target bundleno = 1 (0x1), region = 78 }

</bundles_post_ra>
